<compile_context>
chip_gen: v7x
topology: tpu7x:2x2x1
jax: 0.10.0
libtpu: 0.0.40
codegen_flags: <defaults>
</compile_context>

<pallas_src>
import functools

import jax
import jax.numpy as jnp
import numpy as np
from jax.experimental import pallas as pl
from jax.experimental.pallas import tpu as pltpu

LANE = 128      # vreg lane width
SUBLANE = 8     # f32 sublane count


def _round_up(x, m):
    return (x + m - 1) // m * m


def mlp_kernel(x_ref,
               w1_ref, b1_ref,
               w2_ref, b2_ref,
               w3_ref, b3_ref,
               w4_ref, b4_ref,
               wo_ref, bo_ref,
               o_ref):
    """Fused 4x (Linear+ReLU) + final Linear, all in VMEM, all matmuls on the MXU.

    Matmul inputs are in the weights' compute dtype (f32 or bf16); accumulation, bias add
    and ReLU are f32. Zero padding of hidden/output feature dims is semantics-preserving:
    padded weight rows/columns and bias entries are zero and ReLU(0) == 0.
    """
    h = x_ref[...]
    for w_ref, b_ref in ((w1_ref, b1_ref), (w2_ref, b2_ref),
                         (w3_ref, b3_ref), (w4_ref, b4_ref)):
        h = jnp.dot(h.astype(w_ref.dtype), w_ref[...],
                    preferred_element_type=jnp.float32) + b_ref[...]
        h = jnp.maximum(h, 0.0)
    out = jnp.dot(h.astype(wo_ref.dtype), wo_ref[...],
                  preferred_element_type=jnp.float32) + bo_ref[...]
    o_ref[...] = out.astype(o_ref.dtype)


def prepare_params(params, compute_dtype=jnp.float32, lane_dense_out=True):
    """Pad (to lane-dense widths) and cast the weights ONCE; reuse the result every forward.

    params: ((w1,b1),...,(wo,bo)) with w:[in,out], b:[1,out] (PyTorch weight.T / bias).
    compute_dtype: dtype fed to the MXU (f32 for exactness, bf16 for v6e/v7x throughput).
    lane_dense_out: pad the output width to 128 (unmasked stores; best for small B). For
                    very large B prefer False so only `out_dim` columns hit HBM.
    """
    (w1, b1), (w2, b2), (w3, b3), (w4, b4), (wo, bo) = params
    in_dim, hid_dim = w1.shape
    out_dim = wo.shape[1]
    hid_p = _round_up(hid_dim, LANE)
    out_w = _round_up(out_dim, LANE) if lane_dense_out else out_dim

    def pad2(a, rows, cols, dtype):
        return jnp.pad(a, ((0, rows - a.shape[0]), (0, cols - a.shape[1]))).astype(dtype)

    # Note: w1's row count stays at the *unpadded* in_dim (x's feature axis is not padded).
    return (
        pad2(w1, in_dim, hid_p, compute_dtype), pad2(b1, 1, hid_p, jnp.float32),
        pad2(w2, hid_p, hid_p, compute_dtype), pad2(b2, 1, hid_p, jnp.float32),
        pad2(w3, hid_p, hid_p, compute_dtype), pad2(b3, 1, hid_p, jnp.float32),
        pad2(w4, hid_p, hid_p, compute_dtype), pad2(b4, 1, hid_p, jnp.float32),
        pad2(wo, hid_p, out_w, compute_dtype), pad2(bo, 1, out_w, jnp.float32),
    )


def _choose_tb(batch):
    """Batch tile: one tile for tiny B; 128 so v7x's 2nd TC engages at B>128; 512 for huge B."""
    if batch <= LANE:
        return _round_up(max(batch, 1), SUBLANE)
    if batch >= 4096:
        return 512
    return 128


def _net_forward_impl(x, prepped, out_dim):
    """x: [B, in_dim] float32. prepped: output of prepare_params. Returns [B, out_dim] f32."""
    (w1p, b1p, w2p, b2p, w3p, b3p, w4p, b4p, wop, bop) = prepped
    B, in_dim = x.shape
    out_w = wop.shape[1]

    tb = _choose_tb(B)
    Bp = _round_up(B, tb)
    if Bp != B:
        x = jnp.pad(x, ((0, Bp - B), (0, 0)))     # batch-only pad; feature axis untouched
    x = x.astype(w1p.dtype)

    # Weights/biases: constant index_map -> resident in VMEM across batch tiles.
    def resident(a):
        return pl.BlockSpec(a.shape, lambda i: (0, 0))

    out_padded = pl.pallas_call(
        mlp_kernel,
        out_shape=jax.ShapeDtypeStruct((Bp, out_w), jnp.float32),
        grid=(Bp // tb,),
        in_specs=[
            # x: last block dim equals the full (unpadded) feature dim -> legal, no HBM pad.
            pl.BlockSpec((tb, in_dim), lambda i: (i, 0)),
            resident(w1p), resident(b1p),
            resident(w2p), resident(b2p),
            resident(w3p), resident(b3p),
            resident(w4p), resident(b4p),
            resident(wop), resident(bop),
        ],
        out_specs=pl.BlockSpec((tb, out_w), lambda i: (i, 0)),
        compiler_params=pltpu.CompilerParams(dimension_semantics=("parallel",)),
    )(x, w1p, b1p, w2p, b2p, w3p, b3p, w4p, b4p, wop, bop)

    return out_padded[:B, :out_dim]


# jit the whole wrapper: batch pad, kernel, and trailing slice fuse into one executable.
net_forward = jax.jit(_net_forward_impl, static_argnums=(2,))


def init_linear(key, fan_in, fan_out):
    """Deterministic init mimicking nn.Linear default (uniform +/- 1/sqrt(fan_in))."""
    kw, kb = jax.random.split(key)
    bound = 1.0 / np.sqrt(fan_in)
    # Stored transposed relative to PyTorch ([in, out]) so forward is x @ W + b.
    w = jax.random.uniform(kw, (fan_in, fan_out), jnp.float32, -bound, bound)
    b = jax.random.uniform(kb, (1, fan_out), jnp.float32, -bound, bound)
    return w, b


def reference_forward(x, params):
    h = x
    for (w, b) in params[:-1]:
        h = jnp.maximum(h @ w + b, 0.0)
    wo, bo = params[-1]
    return h @ wo + bo


if __name__ == "__main__":
    # Small shapes consistent with Net(input_dim, output_dim, n_units)
    batch = 8
    input_dim = 4
    n_units = 32
    output_dim = 2

    key = jax.random.PRNGKey(0)
    kx, kx2, k1, k2, k3, k4, ko = jax.random.split(key, 7)

    params = (
        init_linear(k1, input_dim, n_units),
        init_linear(k2, n_units, n_units),
        init_linear(k3, n_units, n_units),
        init_linear(k4, n_units, n_units),
        init_linear(ko, n_units, output_dim),
    )

    # --- small batch, f32 MXU path, lane-dense output (exact check) ---
    x = jax.random.normal(kx, (batch, input_dim), jnp.float32)
    prepped_f32 = prepare_params(params, compute_dtype=jnp.float32, lane_dense_out=True)
    out = jax.block_until_ready(net_forward(x, prepped_f32, output_dim))
    ref = reference_forward(x, params)
    np.testing.assert_allclose(np.asarray(out), np.asarray(ref), rtol=1e-5, atol=1e-5)

    # --- larger batch, bf16 MXU path, grid > 1 (megacore-eligible), narrow output writeback ---
    xb = jax.random.normal(kx2, (512, input_dim), jnp.float32)
    prepped_bf16 = prepare_params(params, compute_dtype=jnp.bfloat16, lane_dense_out=False)
    outb = jax.block_until_ready(net_forward(xb, prepped_bf16, output_dim))
    refb = reference_forward(xb, params)
    np.testing.assert_allclose(np.asarray(outb), np.asarray(refb), rtol=5e-2, atol=5e-2)

    # TODO(synk): fit()/predict() training loop (Adam, MSE + physics loss) is host-side logic,
    # not part of the forward kernel; only forward() is implemented in Pallas.
    print("KERNEL_OK")
</pallas_src>

<mosaic_0001>
module attributes {stable_mosaic.version = 11 : i64} {
  func.func @mlp_kernel(%arg0: i32, %arg1: memref<8x4xf32, #tpu.memory_space<vmem>>, %arg2: memref<4x128xf32, #tpu.memory_space<vmem>>, %arg3: memref<1x128xf32, #tpu.memory_space<vmem>>, %arg4: memref<128x128xf32, #tpu.memory_space<vmem>>, %arg5: memref<1x128xf32, #tpu.memory_space<vmem>>, %arg6: memref<128x128xf32, #tpu.memory_space<vmem>>, %arg7: memref<1x128xf32, #tpu.memory_space<vmem>>, %arg8: memref<128x128xf32, #tpu.memory_space<vmem>>, %arg9: memref<1x128xf32, #tpu.memory_space<vmem>>, %arg10: memref<128x128xf32, #tpu.memory_space<vmem>>, %arg11: memref<1x128xf32, #tpu.memory_space<vmem>>, %arg12: memref<8x128xf32, #tpu.memory_space<vmem>>) attributes {dimension_semantics = [#tpu.dimension_semantics<parallel>], iteration_bounds = array<i64: 1>, scalar_prefetch = 0 : i64, scratch_operands = 0 : i64, tpu.core_type = #tpu.core_type<tc>, window_params = [{transform_indices = @transform_0, window_bounds = array<i64: 8, 4>}, {pipeline_mode = #tpu.pipeline_mode<synchronous>, transform_indices = @transform_1, window_bounds = array<i64: 4, 128>}, {pipeline_mode = #tpu.pipeline_mode<synchronous>, transform_indices = @transform_2, window_bounds = array<i64: 1, 128>}, {pipeline_mode = #tpu.pipeline_mode<synchronous>, transform_indices = @transform_3, window_bounds = array<i64: 128, 128>}, {pipeline_mode = #tpu.pipeline_mode<synchronous>, transform_indices = @transform_4, window_bounds = array<i64: 1, 128>}, {pipeline_mode = #tpu.pipeline_mode<synchronous>, transform_indices = @transform_5, window_bounds = array<i64: 128, 128>}, {pipeline_mode = #tpu.pipeline_mode<synchronous>, transform_indices = @transform_6, window_bounds = array<i64: 1, 128>}, {pipeline_mode = #tpu.pipeline_mode<synchronous>, transform_indices = @transform_7, window_bounds = array<i64: 128, 128>}, {pipeline_mode = #tpu.pipeline_mode<synchronous>, transform_indices = @transform_8, window_bounds = array<i64: 1, 128>}, {pipeline_mode = #tpu.pipeline_mode<synchronous>, transform_indices = @transform_9, window_bounds = array<i64: 128, 128>}, {pipeline_mode = #tpu.pipeline_mode<synchronous>, transform_indices = @transform_10, window_bounds = array<i64: 1, 128>}, {transform_indices = @transform_11, window_bounds = array<i64: 8, 128>}]} {
    %c0 = arith.constant 0 : index
    %c0_0 = arith.constant 0 : index
    %0 = vector.load %arg1[%c0, %c0_0] : memref<8x4xf32, #tpu.memory_space<vmem>>, vector<8x4xf32>
    %c0_1 = arith.constant 0 : index
    %c0_2 = arith.constant 0 : index
    %1 = vector.load %arg2[%c0_1, %c0_2] : memref<4x128xf32, #tpu.memory_space<vmem>>, vector<4x128xf32>
    %cst = arith.constant dense<0.000000e+00> : vector<8x128xf32>
    %2 = tpu.matmul %0, %1, %cst {dimension_numbers = #tpu.dot_dimension_numbers<[1], [0], [0], [1], [0, 0, 1, 1], [], []>} : vector<8x4xf32>, vector<4x128xf32>, vector<8x128xf32> -> vector<8x128xf32>
    %c0_3 = arith.constant 0 : index
    %c0_4 = arith.constant 0 : index
    %3 = vector.load %arg3[%c0_3, %c0_4] : memref<1x128xf32, #tpu.memory_space<vmem>>, vector<1x128xf32>
    %4 = vector.broadcast %3 : vector<1x128xf32> to vector<8x128xf32>
    %5 = arith.addf %2, %4 : vector<8x128xf32>
    %cst_5 = arith.constant 0.000000e+00 : f32
    %6 = vector.broadcast %cst_5 : f32 to vector<8x128xf32>
    %7 = arith.maximumf %5, %6 : vector<8x128xf32>
    %c0_6 = arith.constant 0 : index
    %c0_7 = arith.constant 0 : index
    %8 = vector.load %arg4[%c0_6, %c0_7] : memref<128x128xf32, #tpu.memory_space<vmem>>, vector<128x128xf32>
    %cst_8 = arith.constant dense<0.000000e+00> : vector<8x128xf32>
    %9 = tpu.matmul %7, %8, %cst_8 {dimension_numbers = #tpu.dot_dimension_numbers<[1], [0], [0], [1], [0, 0, 1, 1], [], []>} : vector<8x128xf32>, vector<128x128xf32>, vector<8x128xf32> -> vector<8x128xf32>
    %c0_9 = arith.constant 0 : index
    %c0_10 = arith.constant 0 : index
    %10 = vector.load %arg5[%c0_9, %c0_10] : memref<1x128xf32, #tpu.memory_space<vmem>>, vector<1x128xf32>
    %11 = vector.broadcast %10 : vector<1x128xf32> to vector<8x128xf32>
    %12 = arith.addf %9, %11 : vector<8x128xf32>
    %cst_11 = arith.constant 0.000000e+00 : f32
    %13 = vector.broadcast %cst_11 : f32 to vector<8x128xf32>
    %14 = arith.maximumf %12, %13 : vector<8x128xf32>
    %c0_12 = arith.constant 0 : index
    %c0_13 = arith.constant 0 : index
    %15 = vector.load %arg6[%c0_12, %c0_13] : memref<128x128xf32, #tpu.memory_space<vmem>>, vector<128x128xf32>
    %cst_14 = arith.constant dense<0.000000e+00> : vector<8x128xf32>
    %16 = tpu.matmul %14, %15, %cst_14 {dimension_numbers = #tpu.dot_dimension_numbers<[1], [0], [0], [1], [0, 0, 1, 1], [], []>} : vector<8x128xf32>, vector<128x128xf32>, vector<8x128xf32> -> vector<8x128xf32>
    %c0_15 = arith.constant 0 : index
    %c0_16 = arith.constant 0 : index
    %17 = vector.load %arg7[%c0_15, %c0_16] : memref<1x128xf32, #tpu.memory_space<vmem>>, vector<1x128xf32>
    %18 = vector.broadcast %17 : vector<1x128xf32> to vector<8x128xf32>
    %19 = arith.addf %16, %18 : vector<8x128xf32>
    %cst_17 = arith.constant 0.000000e+00 : f32
    %20 = vector.broadcast %cst_17 : f32 to vector<8x128xf32>
    %21 = arith.maximumf %19, %20 : vector<8x128xf32>
    %c0_18 = arith.constant 0 : index
    %c0_19 = arith.constant 0 : index
    %22 = vector.load %arg8[%c0_18, %c0_19] : memref<128x128xf32, #tpu.memory_space<vmem>>, vector<128x128xf32>
    %cst_20 = arith.constant dense<0.000000e+00> : vector<8x128xf32>
    %23 = tpu.matmul %21, %22, %cst_20 {dimension_numbers = #tpu.dot_dimension_numbers<[1], [0], [0], [1], [0, 0, 1, 1], [], []>} : vector<8x128xf32>, vector<128x128xf32>, vector<8x128xf32> -> vector<8x128xf32>
    %c0_21 = arith.constant 0 : index
    %c0_22 = arith.constant 0 : index
    %24 = vector.load %arg9[%c0_21, %c0_22] : memref<1x128xf32, #tpu.memory_space<vmem>>, vector<1x128xf32>
    %25 = vector.broadcast %24 : vector<1x128xf32> to vector<8x128xf32>
    %26 = arith.addf %23, %25 : vector<8x128xf32>
    %cst_23 = arith.constant 0.000000e+00 : f32
    %27 = vector.broadcast %cst_23 : f32 to vector<8x128xf32>
    %28 = arith.maximumf %26, %27 : vector<8x128xf32>
    %c0_24 = arith.constant 0 : index
    %c0_25 = arith.constant 0 : index
    %29 = vector.load %arg10[%c0_24, %c0_25] : memref<128x128xf32, #tpu.memory_space<vmem>>, vector<128x128xf32>
    %cst_26 = arith.constant dense<0.000000e+00> : vector<8x128xf32>
    %30 = tpu.matmul %28, %29, %cst_26 {dimension_numbers = #tpu.dot_dimension_numbers<[1], [0], [0], [1], [0, 0, 1, 1], [], []>} : vector<8x128xf32>, vector<128x128xf32>, vector<8x128xf32> -> vector<8x128xf32>
    %c0_27 = arith.constant 0 : index
    %c0_28 = arith.constant 0 : index
    %31 = vector.load %arg11[%c0_27, %c0_28] : memref<1x128xf32, #tpu.memory_space<vmem>>, vector<1x128xf32>
    %32 = vector.broadcast %31 : vector<1x128xf32> to vector<8x128xf32>
    %33 = arith.addf %30, %32 : vector<8x128xf32>
    %c0_29 = arith.constant 0 : index
    %c0_30 = arith.constant 0 : index
    %34 = vector.load %arg12[%c0_29, %c0_30] : memref<8x128xf32, #tpu.memory_space<vmem>>, vector<8x128xf32>
    tpu.vector_store %arg12[%c0_29, %c0_30], %33 {strides = array<i32>} : memref<8x128xf32, #tpu.memory_space<vmem>>, vector<8x128xf32>,
    return
  }
  func.func @transform_0(%arg0: i32) -> (i32, i32) {
    %c0_i32 = arith.constant 0 : i32
    %c0_i32_0 = arith.constant 0 : i32
    return %arg0, %c0_i32 : i32, i32
  }
  func.func @transform_1(%arg0: i32) -> (i32, i32) {
    %c0_i32 = arith.constant 0 : i32
    %c0_i32_0 = arith.constant 0 : i32
    %c0_i32_1 = arith.constant 0 : i32
    return %c0_i32, %c0_i32_0 : i32, i32
  }
  func.func @transform_2(%arg0: i32) -> (i32, i32) {
    %c0_i32 = arith.constant 0 : i32
    %c0_i32_0 = arith.constant 0 : i32
    %c0_i32_1 = arith.constant 0 : i32
    return %c0_i32, %c0_i32_0 : i32, i32
  }
  func.func @transform_3(%arg0: i32) -> (i32, i32) {
    %c0_i32 = arith.constant 0 : i32
    %c0_i32_0 = arith.constant 0 : i32
    %c0_i32_1 = arith.constant 0 : i32
    return %c0_i32, %c0_i32_0 : i32, i32
  }
  func.func @transform_4(%arg0: i32) -> (i32, i32) {
    %c0_i32 = arith.constant 0 : i32
    %c0_i32_0 = arith.constant 0 : i32
    %c0_i32_1 = arith.constant 0 : i32
    return %c0_i32, %c0_i32_0 : i32, i32
  }
  func.func @transform_5(%arg0: i32) -> (i32, i32) {
    %c0_i32 = arith.constant 0 : i32
    %c0_i32_0 = arith.constant 0 : i32
    %c0_i32_1 = arith.constant 0 : i32
    return %c0_i32, %c0_i32_0 : i32, i32
  }
  func.func @transform_6(%arg0: i32) -> (i32, i32) {
    %c0_i32 = arith.constant 0 : i32
    %c0_i32_0 = arith.constant 0 : i32
    %c0_i32_1 = arith.constant 0 : i32
    return %c0_i32, %c0_i32_0 : i32, i32
  }
  func.func @transform_7(%arg0: i32) -> (i32, i32) {
    %c0_i32 = arith.constant 0 : i32
    %c0_i32_0 = arith.constant 0 : i32
    %c0_i32_1 = arith.constant 0 : i32
    return %c0_i32, %c0_i32_0 : i32, i32
  }
  func.func @transform_8(%arg0: i32) -> (i32, i32) {
    %c0_i32 = arith.constant 0 : i32
    %c0_i32_0 = arith.constant 0 : i32
    %c0_i32_1 = arith.constant 0 : i32
    return %c0_i32, %c0_i32_0 : i32, i32
  }
  func.func @transform_9(%arg0: i32) -> (i32, i32) {
    %c0_i32 = arith.constant 0 : i32
    %c0_i32_0 = arith.constant 0 : i32
    %c0_i32_1 = arith.constant 0 : i32
    return %c0_i32, %c0_i32_0 : i32, i32
  }
  func.func @transform_10(%arg0: i32) -> (i32, i32) {
    %c0_i32 = arith.constant 0 : i32
    %c0_i32_0 = arith.constant 0 : i32
    %c0_i32_1 = arith.constant 0 : i32
    return %c0_i32, %c0_i32_0 : i32, i32
  }
  func.func @transform_11(%arg0: i32) -> (i32, i32) {
    %c0_i32 = arith.constant 0 : i32
    %c0_i32_0 = arith.constant 0 : i32
    return %arg0, %c0_i32 : i32, i32
  }
}

</mosaic_0001>

<bundles_post_ra>
// kernel: _net_forward_impl.1
= control target key start
LH: loop header
LB: loop body
LE: loop exit
PB: predicated region body
PF: predicated region fallthrough
CT: control target
= control target key end

     0   :  { %16 = vsyncpa [#allocation3], 0  ;;  %s1195_s0 = inlined_call_operand.vmem [shape: f32[8,4], index: 0, kind: input, shape index: {}]   ;;  %s1196_s1 = inlined_call_operand.vmem [shape: f32[4,128], index: 1, kind: input, shape index: {}]   ;;  %s1197_s2 = inlined_call_operand.vmem [shape: f32[1,128], index: 2, kind: input, shape index: {}]   ;;  %s1198_s3 = inlined_call_operand.hbm [shape: f32[128,128], index: 3, kind: input, shape index: {}]   ;;  %s1199_s4 = inlined_call_operand.vmem [shape: f32[1,128], index: 4, kind: input, shape index: {}]   ;;  %s1200_s5 = inlined_call_operand.hbm [shape: f32[128,128], index: 5, kind: input, shape index: {}]   ;;  %s1201_s6 = inlined_call_operand.vmem [shape: f32[1,128], index: 6, kind: input, shape index: {}]   ;;  %s1202_s7 = inlined_call_operand.hbm [shape: f32[128,128], index: 7, kind: input, shape index: {}]   ;;  %s1203_s8 = inlined_call_operand.vmem [shape: f32[1,128], index: 8, kind: input, shape index: {}]   ;;  %s1204_s9 = inlined_call_operand.hbm [shape: f32[128,128], index: 9, kind: input, shape index: {}]   ;;  %s1205_s10 = inlined_call_operand.vmem [shape: f32[1,128], index: 10, kind: input, shape index: {}]   ;;  %s1206_s11 = inlined_call_operand.vmem [shape: f32[8,128], index: 11, kind: output, shape index: {}]  }
   0x1   :  { %17 = vsyncpa [#allocation5], 0 }
   0x2   :  { %18 = vsyncpa [#allocation8], 0  ;;  %s985_s17 = smov [#allocation4]   ;;  %s986_s19 = smov [#allocation2]  }
   0x3   :  { %s44_s18 = sshll.u32 %s985_s17, 4  ;;  %s30_s20 = sshll.u32 %s986_s19, 4  ;;  %s45_s18 = int_to_ptr.vmem [resolvable:$true] %s44_s18  ;;  %s1054_s20 = int_to_ptr.vmem [resolvable:$true] %s30_s20 }
   0x4   :  { %s891_s23 = scalar_lea.hbm %s1200_s5, 2048 }
   0x5   :  { %p892_p0 = scmp.ne.s32.totalorder %s1200_s5, %s891_s23  ;;  %p895_p1 = scmp.lt.u32.totalorder %s891_s23, %s1200_s5 }
   0x7   :  { %p897_p2 = pnand %p895_p1, %p892_p0 }
   0x9   :  { %900 = shalt.err (!%p897_p2)
}
   0xa   :  { %s901_s28 = scalar_lea.vmem %s45_s18, 2048  ;;  %p906_p4 = scmp.lt.s32.totalorder %s45_s18, %s45_s18 }
   0xb   :  { %p902_p3 = scmp.ne.s32.totalorder %s45_s18, %s901_s28  ;;  %p907_p5 = scmp.lt.s32.totalorder %s901_s28, %s901_s28 }
   0xd   :  { %p908_p6 = por %p907_p5, %p906_p4 }
   0xf   :  { %p909_p7 = pnand %p908_p6, %p902_p3 }
  0x11   :  { %912 = shalt.err (!%p909_p7)
}
  0x12   :  { %s987_s29 = smov 128   ;;  %s988_s30 = smov 8  }
  0x13   :  { %50 = dma.hbm_to_vmem [thread:$0]  %s1200_s5, 2048, %s45_s18, [#allocation5], %s987_s29, %s987_s29, %s988_s30  }
  0x14   :  { %s913_s16 = scalar_lea.hbm %s1198_s3, 2048 }
  0x15   :  { %p914_p8 = scmp.ne.s32.totalorder %s1198_s3, %s913_s16  ;;  %p917_p9 = scmp.lt.u32.totalorder %s913_s16, %s1198_s3 }
  0x17   :  { %p919_p10 = pnand %p917_p9, %p914_p8 }
  0x19   :  { %922 = shalt.err (!%p919_p10)
}
  0x1a   :  { %s923_s23 = scalar_lea.vmem %s1054_s20, 2048  ;;  %p928_p12 = scmp.lt.s32.totalorder %s1054_s20, %s1054_s20 }
  0x1b   :  { %p924_p11 = scmp.ne.s32.totalorder %s1054_s20, %s923_s23  ;;  %p929_p13 = scmp.lt.s32.totalorder %s923_s23, %s923_s23 }
  0x1d   :  { %p930_p0 = por %p929_p13, %p928_p12 }
  0x1f   :  { %p931_p1 = pnand %p930_p0, %p924_p11 }
  0x21   :  { %934 = shalt.err (!%p931_p1)
}
  0x22   :  { %36 = dma.hbm_to_vmem [thread:$0]  %s1198_s3, 2048, %s1054_s20, [#allocation3], %s987_s29, %s987_s29, %s988_s30  }
  0x23   :  { %s989_s24 = smov [#allocation6]   ;;  %s990_s26 = smov [#allocation7]  }
  0x24   :  { %s58_s25 = sshll.u32 %s989_s24, 4  ;;  %s72_s27 = sshll.u32 %s990_s26, 4  ;;  %s59_s25 = int_to_ptr.vmem [resolvable:$true] %s58_s25  ;;  %s1091_s27 = int_to_ptr.vmem [resolvable:$true] %s72_s27 }
  0x25   :  { %s935_s13 = scalar_lea.hbm %s1202_s7, 2048 }
  0x26   :  { %p936_p2 = scmp.ne.s32.totalorder %s1202_s7, %s935_s13  ;;  %p939_p3 = scmp.lt.u32.totalorder %s935_s13, %s1202_s7 }
  0x28   :  { %p941_p4 = pnand %p939_p3, %p936_p2 }
  0x2a   :  { %944 = shalt.err (!%p941_p4)
}
  0x2b   :  { %s945_s3 = scalar_lea.vmem %s59_s25, 2048  ;;  %p950_p6 = scmp.lt.s32.totalorder %s59_s25, %s59_s25 }
  0x2c   :  { %p946_p5 = scmp.ne.s32.totalorder %s59_s25, %s945_s3  ;;  %p951_p7 = scmp.lt.s32.totalorder %s945_s3, %s945_s3 }
  0x2e   :  { %p952_p8 = por %p951_p7, %p950_p6 }
  0x30   :  { %p953_p9 = pnand %p952_p8, %p946_p5 }
  0x32   :  { %956 = shalt.err (!%p953_p9)
}
  0x33   :  { %64 = dma.hbm_to_vmem [thread:$0]  %s1202_s7, 2048, %s59_s25, [#allocation5], %s987_s29, %s987_s29, %s988_s30  }
  0x34   :  { %s957_s23 = scalar_lea.hbm %s1204_s9, 2048 }
  0x35   :  { %p958_p10 = scmp.ne.s32.totalorder %s1204_s9, %s957_s23  ;;  %p961_p11 = scmp.lt.u32.totalorder %s957_s23, %s1204_s9 }
  0x37   :  { %p963_p12 = pnand %p961_p11, %p958_p10 }
  0x39   :  { %966 = shalt.err (!%p963_p12)
}
  0x3a   :  { %s967_s28 = scalar_lea.vmem %s1091_s27, 2048  ;;  %p972_p0 = scmp.lt.s32.totalorder %s1091_s27, %s1091_s27 }
  0x3b   :  { %p968_p13 = scmp.ne.s32.totalorder %s1091_s27, %s967_s28  ;;  %p973_p1 = scmp.lt.s32.totalorder %s967_s28, %s967_s28 }
  0x3d   :  { %p974_p2 = por %p973_p1, %p972_p0 }
  0x3f   :  { %p975_p3 = pnand %p974_p2, %p968_p13 }
  0x41   :  { %978 = shalt.err (!%p975_p3)
}
  0x42   :  { %78 = dma.hbm_to_vmem [thread:$0]  %s1204_s9, 2048, %s1091_s27, [#allocation8], %s987_s29, %s987_s29, %s988_s30  }
  0x43   :  { %979 = dma.done.wait [#allocation3], 2048  }
  0x44   :  { %980 = vsyncadd [#allocation3], 4294965248 }
  0x45   :  { %981 = dma.done.wait [#allocation5], 4096  }
  0x46   :  { %982 = vsyncadd [#allocation5], 4294963200 }
  0x47   :  { %983 = dma.done.wait [#allocation8], 2048  }
  0x48   :  { %984 = vsyncadd [#allocation8], 4294965248  ;;  %v991_v0 = vmov 0.0   ;;  %vm992_vm0 = vmmov 0   ;;  %v993_v1 = vmov 0.0|0.0   ;;  %vm106_vm1 = vcmask 1043456  }
  0x49   :  { %641 = vmatprep.subr.mxu0 %v991_v0  ;;  %643 = vmatprep.mubr.msk.f32.mxu0 %vm992_vm0, %v991_v0  ;;  %vm102_vm2 = vcmask 31744   ;;  %v94_v2 = vld [vmem:[%s1196_s1] sm:$0xf]  ;;  %v182_v5 = vld [vmem:[#allocation2 + $0x8] sm:$0xff]  ;;  %v183_v6 = vld [vmem:[#allocation2 + $0x10] sm:$0xff] }
  0x4a   :  { %786 = vmatprep.subr.bf16.mxu1 %v993_v1  ;;  %678 = vmatprep.mubr.msk.f32.mxu1 %vm992_vm0, %v991_v0  ;;  %v93_v3 = vld [vmem:[%s1195_s0] sm:$0xff]  ;;  %v184_v7 = vld [vmem:[#allocation2 + $0x18] sm:$0xff]  ;;  %v186_v11 = vld [vmem:[#allocation2 + $0x28] sm:$0xff] }
  0x4b   :  { %v181_v4 = vld [vmem:[#allocation2] sm:$0xff]  ;;  %642 = vmatpush3.msk.msra.mxu0 %vm106_vm1, %v94_v2  ;;  %v790_v9 = vpack.c.bf16 %v184_v7, %v183_v6  ;;  %v187_v13 = vld [vmem:[#allocation2 + $0x30] sm:$0xff]  ;;  %v188_v14 = vld [vmem:[#allocation2 + $0x38] sm:$0xff] }
  0x4c   :  { %644 = vmatmul.mubr.msk.f32.vlgmr.msra.gmra.mrb[0].mxu0 %vm102_vm2, %v93_v3  ;;  %v787_v8 = vpack.c.bf16 %v182_v5, %v181_v4  ;;  %810 = vmatprep.subr.bf16.mxu0 %v993_v1  ;;  %v185_v10 = vld [vmem:[#allocation2 + $0x20] sm:$0xff]  ;;  %v796_v15 = vpack.c.bf16 %v188_v14, %v187_v13  ;;  %v190_v17 = vld [vmem:[#allocation2 + $0x48] sm:$0xff]  ;;  %v191_v19 = vld [vmem:[#allocation2 + $0x50] sm:$0xff] }
  0x4d   :  { %713 = vmatprep.mubr.msk.f32.mxu0 %vm992_vm0, %v991_v0  ;;  %v793_v12 = vpack.c.bf16 %v186_v11, %v185_v10  ;;  %v189_v16 = vld [vmem:[#allocation2 + $0x40] sm:$0xff]  ;;  %v192_v20 = vld [vmem:[#allocation2 + $0x58] sm:$0xff]  ;;  %v194_v23 = vld [vmem:[#allocation2 + $0x68] sm:$0xff] }
  0x4e   :  { %788 = vmatpush3.bf16.msra.mxu1 %v787_v8  ;;  %v799_v18 = vpack.c.bf16 %v190_v17, %v189_v16  ;;  %v802_v21 = vpack.c.bf16 %v192_v20, %v191_v19  ;;  %v193_v22 = vld [vmem:[#allocation2 + $0x60] sm:$0xff]  ;;  %v195_v25 = vld [vmem:[#allocation2 + $0x70] sm:$0xff]  ;;  %v196_v26 = vld [vmem:[#allocation2 + $0x78] sm:$0xff] }
  0x4f   :  { %789 = vmatprep.subr.bf16.mxu1 %v993_v1  ;;  %v805_v24 = vpack.c.bf16 %v194_v23, %v193_v22  ;;  %v808_v27 = vpack.c.bf16 %v196_v26, %v195_v25  ;;  %v275_v28 = vld [vmem:[#allocation4] sm:$0xff]  ;;  %v276_v29 = vld [vmem:[#allocation4 + $0x8] sm:$0xff]  ;;  %v277_v30 = vld [vmem:[#allocation4 + $0x10] sm:$0xff] }
  0x50   :  { %v811_v31 = vpack.c.bf16 %v276_v29, %v275_v28  ;;  %v278_v32 = vld [vmem:[#allocation4 + $0x18] sm:$0xff]  ;;  %v279_v34 = vld [vmem:[#allocation4 + $0x20] sm:$0xff]  ;;  %v280_v35 = vld [vmem:[#allocation4 + $0x28] sm:$0xff] }
  0x51   :  { %v814_v33 = vpack.c.bf16 %v278_v32, %v277_v30  ;;  %v817_v36 = vpack.c.bf16 %v280_v35, %v279_v34  ;;  %v281_v37 = vld [vmem:[#allocation4 + $0x30] sm:$0xff]  ;;  %v282_v38 = vld [vmem:[#allocation4 + $0x38] sm:$0xff]  ;;  %v283_v40 = vld [vmem:[#allocation4 + $0x40] sm:$0xff] }
  0x52   :  { %791 = vmatpush3.bf16.msra.mxu1 %v790_v9  ;;  %812 = vmatpush3.bf16.msra.mxu0 %v811_v31  ;;  %v820_v39 = vpack.c.bf16 %v282_v38, %v281_v37  ;;  %v284_v41 = vld [vmem:[#allocation4 + $0x48] sm:$0xff]  ;;  %v285_v43 = vld [vmem:[#allocation4 + $0x50] sm:$0xff]  ;;  %v286_v44 = vld [vmem:[#allocation4 + $0x58] sm:$0xff] }
  0x53   :  { %792 = vmatprep.subr.bf16.mxu1 %v993_v1  ;;  %813 = vmatprep.subr.bf16.mxu0 %v993_v1  ;;  %v823_v42 = vpack.c.bf16 %v284_v41, %v283_v40  ;;  %v826_v45 = vpack.c.bf16 %v286_v44, %v285_v43  ;;  %v287_v46 = vld [vmem:[#allocation4 + $0x60] sm:$0xff]  ;;  %v288_v47 = vld [vmem:[#allocation4 + $0x68] sm:$0xff]  ;;  %v289_v54 = vld [vmem:[#allocation4 + $0x70] sm:$0xff] }
  0x54   :  { %v829_v48 = vpack.c.bf16 %v288_v47, %v287_v46  ;;  %v564_v49 = vld [vmem:[%s1197_s2] ss:$0 sm:$0xff]  ;;  %v290_v55 = vld [vmem:[#allocation4 + $0x78] sm:$0xff]  ;;  %v370_v58 = vld [vmem:[#allocation6 + $0x8] sm:$0xff] }
  0x55   :  { %v832_v56 = vpack.c.bf16 %v290_v55, %v289_v54  ;;  %v369_v57 = vld [vmem:[#allocation6] sm:$0xff]  ;;  %v371_v59 = vld [vmem:[#allocation6 + $0x10] sm:$0xff]  ;;  %v372_v61 = vld [vmem:[#allocation6 + $0x18] sm:$0xff] }
  0x56   :  { %794 = vmatpush3.bf16.msra.mxu1 %v793_v12  ;;  %815 = vmatpush3.bf16.msra.mxu0 %v814_v33  ;;  %v835_v60 = vpack.c.bf16 %v370_v58, %v369_v57  ;;  %v838_v62 = vpack.c.bf16 %v372_v61, %v371_v59  ;;  %v373_v63 = vld [vmem:[#allocation6 + $0x20] sm:$0xff]  ;;  %v374_v2 = vld [vmem:[#allocation6 + $0x28] sm:$0xff]  ;;  %v375_v4 = vld [vmem:[#allocation6 + $0x30] sm:$0xff] }
  0x57   :  { %795 = vmatprep.subr.bf16.mxu1 %v993_v1  ;;  %816 = vmatprep.subr.bf16.mxu0 %v993_v1  ;;  %v841_v3 = vpack.c.bf16 %v374_v2, %v373_v63  ;;  %v376_v5 = vld [vmem:[#allocation6 + $0x38] sm:$0xff]  ;;  %v377_v7 = vld [vmem:[#allocation6 + $0x40] sm:$0xff]  ;;  %v378_v8 = vld [vmem:[#allocation6 + $0x48] sm:$0xff] }
  0x58   :  { %v844_v6 = vpack.c.bf16 %v376_v5, %v375_v4  ;;  %v847_v9 = vpack.c.bf16 %v378_v8, %v377_v7  ;;  %v379_v10 = vld [vmem:[#allocation6 + $0x50] sm:$0xff]  ;;  %v380_v11 = vld [vmem:[#allocation6 + $0x58] sm:$0xff]  ;;  %v381_v13 = vld [vmem:[#allocation6 + $0x60] sm:$0xff] }
  0x59   :  { %v850_v12 = vpack.c.bf16 %v380_v11, %v379_v10  ;;  %v382_v14 = vld [vmem:[#allocation6 + $0x68] sm:$0xff]  ;;  %v567_v16 = vld [vmem:[%s1199_s4] ss:$0 sm:$0xff]  ;;  %v384_v22 = vld [vmem:[#allocation6 + $0x78] sm:$0xff] }
  0x5a   :  { %797 = vmatpush3.bf16.msra.mxu1 %v796_v15  ;;  %818 = vmatpush3.bf16.msra.mxu0 %v817_v36  ;;  %v853_v15 = vpack.c.bf16 %v382_v14, %v381_v13  ;;  %v464_v25 = vld [vmem:[#allocation7 + $0x8] sm:$0xff]  ;;  %v465_v26 = vld [vmem:[#allocation7 + $0x10] sm:$0xff]  ;;  %v466_v28 = vld [vmem:[#allocation7 + $0x18] sm:$0xff] }
  0x5b   :  { %798 = vmatprep.subr.bf16.mxu1 %v993_v1  ;;  %819 = vmatprep.subr.bf16.mxu0 %v993_v1  ;;  %v862_v29 = vpack.c.bf16 %v466_v28, %v465_v26  ;;  %v467_v30 = vld [vmem:[#allocation7 + $0x20] sm:$0xff]  ;;  %v468_v31 = vld [vmem:[#allocation7 + $0x28] sm:$0xff]  ;;  %v470_v33 = vld [vmem:[#allocation7 + $0x38] sm:$0xff] }
  0x5c   :  { %v865_v32 = vpack.c.bf16 %v468_v31, %v467_v30  ;;  %v471_v35 = vld [vmem:[#allocation7 + $0x40] sm:$0xff]  ;;  %v472_v36 = vld [vmem:[#allocation7 + $0x48] sm:$0xff]  ;;  %v473_v38 = vld [vmem:[#allocation7 + $0x50] sm:$0xff] }
  0x5d   :  { %v871_v37 = vpack.c.bf16 %v472_v36, %v471_v35  ;;  %v475_v41 = vld [vmem:[#allocation7 + $0x60] sm:$0xff] }
  0x5e   :  { %800 = vmatpush3.bf16.msra.mxu1 %v799_v18  ;;  %821 = vmatpush3.bf16.msra.mxu0 %v820_v39  ;;  %v474_v39 = vld [vmem:[#allocation7 + $0x58] sm:$0xff]  ;;  %v568_v44 = vld [vmem:[%s1201_s6] ss:$0 sm:$0xff] }
  0x5f   :  { %801 = vmatprep.subr.bf16.mxu1 %v993_v1  ;;  %822 = vmatprep.subr.bf16.mxu0 %v993_v1  ;;  %v874_v40 = vpack.c.bf16 %v474_v39, %v473_v38 }
  0x62   :  { %803 = vmatpush3.bf16.msra.mxu1 %v802_v21  ;;  %824 = vmatpush3.bf16.msra.mxu0 %v823_v42  ;;  %v383_v21 = vld [vmem:[#allocation6 + $0x70] sm:$0xff]  ;;  %v476_v42 = vld [vmem:[#allocation7 + $0x68] sm:$0xff] }
  0x63   :  { %804 = vmatprep.subr.bf16.mxu1 %v993_v1  ;;  %825 = vmatprep.subr.bf16.mxu0 %v993_v1  ;;  %v856_v23 = vpack.c.bf16 %v384_v22, %v383_v21  ;;  %v877_v43 = vpack.c.bf16 %v476_v42, %v475_v41 }
  0x66   :  { %806 = vmatpush3.bf16.msra.mxu1 %v805_v24  ;;  %827 = vmatpush3.bf16.msra.mxu0 %v826_v45  ;;  %v463_v24 = vld [vmem:[#allocation7] sm:$0xff] }
  0x67   :  { %807 = vmatprep.subr.bf16.mxu1 %v993_v1  ;;  %828 = vmatprep.subr.bf16.mxu0 %v993_v1 }
  0x6a   :  { %809 = vmatpush3.bf16.msra.mxu1 %v808_v27  ;;  %830 = vmatpush3.bf16.msra.mxu0 %v829_v48  ;;  %v859_v27 = vpack.c.bf16 %v464_v25, %v463_v24 }
  0x6b   :  { %834 = vmatprep.subr.bf16.mxu1 %v993_v1  ;;  %831 = vmatprep.subr.bf16.mxu0 %v993_v1 }
  0x6e   :  { %833 = vmatpush3.bf16.msra.mxu0 %v832_v56  ;;  %v570_v56 = vld [vmem:[%s1205_s10] ss:$0 sm:$0xff] }
  0x6f   :  { %858 = vmatprep.subr.bf16.mxu0 %v993_v1 }
 0x11f   :  { %v176_v50 = vpop.f32.mrb[0].mxu0 }
 0x120   :  { %v177_v51 = vadd.f32 %v564_v49, %v176_v50  ;;  %v645_v52 = vpop.f32.mrb[1].mxu0  ;;  %v477_v49 = vld [vmem:[#allocation7 + $0x70] sm:$0xff]  ;;  %v478_v50 = vld [vmem:[#allocation7 + $0x78] sm:$0xff] }
 0x121   :  { %v569_v52 = vld [vmem:[%s1203_s8] ss:$0 sm:$0xff] }
 0x122   :  { %v180_v53 = vmax.f32 %v177_v51, 0.0  ;;  %v880_v51 = vpack.c.bf16 %v478_v50, %v477_v49 }
 0x124   :  { %679 = vmatmul.mubr.f32.vlgmr.msra.gmra.mrb[0].mxu1 %v180_v53 }
 0x125   :  { %748 = vmatprep.mubr.msk.f32.mxu1 %vm992_vm0, %v991_v0  ;;  %836 = vmatpush3.bf16.msra.mxu1 %v835_v60 }
 0x126   :  { %837 = vmatprep.subr.bf16.mxu1 %v993_v1 }
 0x129   :  { %839 = vmatpush3.bf16.msra.mxu1 %v838_v62 }
 0x12a   :  { %840 = vmatprep.subr.bf16.mxu1 %v993_v1 }
 0x12d   :  { %842 = vmatpush3.bf16.msra.mxu1 %v841_v3 }
 0x12e   :  { %843 = vmatprep.subr.bf16.mxu1 %v993_v1 }
 0x131   :  { %845 = vmatpush3.bf16.msra.mxu1 %v844_v6 }
 0x132   :  { %846 = vmatprep.subr.bf16.mxu1 %v993_v1 }
 0x135   :  { %848 = vmatpush3.bf16.msra.mxu1 %v847_v9 }
 0x136   :  { %849 = vmatprep.subr.bf16.mxu1 %v993_v1 }
 0x139   :  { %851 = vmatpush3.bf16.msra.mxu1 %v850_v12 }
 0x13a   :  { %852 = vmatprep.subr.bf16.mxu1 %v993_v1 }
 0x13d   :  { %854 = vmatpush3.bf16.msra.mxu1 %v853_v15 }
 0x13e   :  { %855 = vmatprep.subr.bf16.mxu1 %v993_v1 }
 0x141   :  { %857 = vmatpush3.bf16.msra.mxu1 %v856_v23 }
 0x1f7   :  { %v270_v17 = vpop.f32.mrb[0].mxu1 }
 0x1f8   :  { %v271_v18 = vadd.f32 %v567_v16, %v270_v17  ;;  %v680_v19 = vpop.f32.mrb[1].mxu1 }
 0x1fa   :  { %v274_v20 = vmax.f32 %v271_v18, 0.0 }
 0x1fc   :  { %714 = vmatmul.mubr.f32.vlgmr.msra.gmra.mrb[2].mxu0 %v274_v20 }
 0x1fd   :  { %783 = vmatprep.mubr.msk.f32.mxu0 %vm992_vm0, %v991_v0  ;;  %860 = vmatpush3.bf16.msra.mxu0 %v859_v27  ;;  %v469_v0 = vld [vmem:[#allocation7 + $0x30] sm:$0xff] }
 0x1fe   :  { %861 = vmatprep.subr.bf16.mxu0 %v993_v1  ;;  %v868_v34 = vpack.c.bf16 %v470_v33, %v469_v0 }
 0x201   :  { %863 = vmatpush3.bf16.msra.mxu0 %v862_v29 }
 0x202   :  { %864 = vmatprep.subr.bf16.mxu0 %v993_v1 }
 0x205   :  { %866 = vmatpush3.bf16.msra.mxu0 %v865_v32 }
 0x206   :  { %867 = vmatprep.subr.bf16.mxu0 %v993_v1 }
 0x209   :  { %869 = vmatpush3.bf16.msra.mxu0 %v868_v34 }
 0x20a   :  { %870 = vmatprep.subr.bf16.mxu0 %v993_v1 }
 0x20d   :  { %872 = vmatpush3.bf16.msra.mxu0 %v871_v37 }
 0x20e   :  { %873 = vmatprep.subr.bf16.mxu0 %v993_v1 }
 0x211   :  { %875 = vmatpush3.bf16.msra.mxu0 %v874_v40 }
 0x212   :  { %876 = vmatprep.subr.bf16.mxu0 %v993_v1 }
 0x215   :  { %878 = vmatpush3.bf16.msra.mxu0 %v877_v43 }
 0x216   :  { %879 = vmatprep.subr.bf16.mxu0 %v993_v1 }
 0x219   :  { %881 = vmatpush3.bf16.msra.mxu0 %v880_v51 }
 0x2cf   :  { %v364_v45 = vpop.f32.mrb[2].mxu0 }
 0x2d0   :  { %v365_v46 = vadd.f32 %v568_v44, %v364_v45  ;;  %v715_v47 = vpop.f32.mrb[3].mxu0 }
 0x2d2   :  { %v368_v48 = vmax.f32 %v365_v46, 0.0 }
 0x2d4   :  { %749 = vmatmul.mubr.f32.vlgmr.msra.gmra.mrb[2].mxu1 %v368_v48 }
 0x3a7   :  { %v458_v53 = vpop.f32.mrb[2].mxu1 }
 0x3a8   :  { %v459_v54 = vadd.f32 %v569_v52, %v458_v53  ;;  %v750_v1 = vpop.f32.mrb[3].mxu1 }
 0x3aa   :  { %v462_v55 = vmax.f32 %v459_v54, 0.0 }
 0x3ac   :  { %784 = vmatmul.mubr.f32.vlgmr.msra.gmra.mrb[4].mxu0 %v462_v55 }
 0x47f   :  { %v552_v57 = vpop.f32.mrb[4].mxu0 }
 0x480   :  { %v553_v58 = vadd.f32 %v570_v56, %v552_v57  ;;  %v785_v59 = vpop.f32.mrb[5].mxu0 }
 0x482   :  { %556 = vst [vmem:[%s1206_s11] sm:$0xff] %v553_v58 }
 0x483   :  { %561 = vsyncpa [#allocation3], 1 }
 0x484   :  { %562 = vsyncpa [#allocation5], 1 }
 0x485   :  { %563 = vsyncpa [#allocation8], 1 }

</bundles_post_ra>
